<compile_context>
chip_gen: v6e
topology: v6e:2x2x1
jax: 0.10.0
libtpu: 0.0.40
codegen_flags: <defaults>
</compile_context>

<pallas_src>
import functools
import math

import jax
import jax.numpy as jnp
import numpy as np
from jax.experimental import pallas as pl
from jax.experimental.pallas import tpu as pltpu

MUL_TIME = 16       # 16x0e time embedding
MUL_S_IN = 16       # 16x0e node-feature scalars (dead branch, not shipped to the kernel)
MUL_V_IN = 16       # 16x1o node-feature vectors
C_S = MUL_TIME + MUL_S_IN            # 32x0e in the sorted head irreps (reference only)
C_V = MUL_V_IN                       # 16x1o in the sorted head irreps
VEC_DIM = 3 * MUL_V_IN               # 48 lane-packed vector components
FEAT_DIM = MUL_S_IN + 3 * MUL_V_IN   # 64
NUM_LAYERS = 2
SPATIAL_DIM = 3
BN_EPS = 1e-5

# e3nn FullyConnectedTensorProduct path coefficient (component/element norm):
#   0e x 1o -> 1o : sqrt(3 / (16*16)) * w3j(0,1,1) = 1/16
TP_COEFF = 1.0 / math.sqrt(MUL_TIME * MUL_V_IN)


def _silu_normalize2mom_cst():
    # e3nn Activation wraps the gate with normalize2mom; only affects the dead
    # 0e branch, kept for the full-semantics reference.
    xs = np.linspace(-12.0, 12.0, 240001)
    dx = xs[1] - xs[0]
    pdf = np.exp(-0.5 * xs * xs) / np.sqrt(2.0 * np.pi)
    silu = xs / (1.0 + np.exp(-xs))
    second_moment = np.sum(silu * silu * pdf) * dx
    return float(1.0 / np.sqrt(second_moment))


SILU_CST = _silu_normalize2mom_cst()


# --------------------------------------------------------------------------- #
# Pallas kernel
# --------------------------------------------------------------------------- #
def _head_kernel(x_ref, w_ref, o_ref, *, num_layers):
    f32 = jnp.float32
    bf16 = jnp.bfloat16

    # Time-mixing FullyConnectedTensorProduct: the per-row time scale was fused
    # into the packed slab in the wrapper; the remaining channel mixing is one
    # bf16 matmul against the pre-contracted TP weight block.
    xv = jnp.dot(x_ref[...], w_ref[0:VEC_DIM, :],
                 preferred_element_type=f32)                                   # [N,48] f32

    for layer in range(num_layers):
        r0 = (layer + 1) * VEC_DIM
        # o3.Linear on 16x1o (1/sqrt(fan_in) and the previous layer's BN gamma
        # folded into the weight block host-side).  kron(I3, w) keeps the three
        # m components equivariant while using a single MXU pass.
        xv = jnp.dot(xv.astype(bf16), w_ref[r0:r0 + VEC_DIM, :],
                     preferred_element_type=f32)                               # [N,48] f32

        # e3nn BatchNorm (train mode, 'component', reduce='mean') on 16x1o:
        # per-channel mean of field^2 over the batch and the 3 m components,
        # no centering, no bias.  Statistics and rsqrt stay in f32.
        col = jnp.mean(xv * xv, axis=0, keepdims=True)                         # [1,48]
        norm16 = (col[:, 0:MUL_V_IN]
                  + col[:, MUL_V_IN:2 * MUL_V_IN]
                  + col[:, 2 * MUL_V_IN:3 * MUL_V_IN]) * (1.0 / 3.0)           # [1,16]
        scale16 = jax.lax.rsqrt(norm16 + BN_EPS)                               # [1,16]
        scale48 = jnp.concatenate([scale16, scale16, scale16], axis=-1)        # [1,48]

        if layer + 1 < num_layers:
            # Activation is identity on 1o (silu only touches the dead 0e
            # branch), so the layer ends with the BN scale.
            xv = xv * scale48
        else:
            # Last layer: fold the BN scale into the transposed, gamma-folded
            # readout weight (a [3,48] row-broadcast multiply) instead of an
            # [N,48] normalization pass, then contract on the 48 lanes.
            ro0 = (num_layers + 1) * VEC_DIM
            w_ro_t = w_ref[ro0:ro0 + SPATIAL_DIM, :].astype(f32) * scale48     # [3,48]
            o_ref[...] = jax.lax.dot_general(
                xv.astype(bf16), w_ro_t.astype(bf16),
                dimension_numbers=(((1,), (1,)), ((), ())),
                preferred_element_type=f32).astype(o_ref.dtype)                # [N,3]


# --------------------------------------------------------------------------- #
# Parameters (e3nn stores unit-normal weights, dividing by sqrt(fan_in) at use)
# --------------------------------------------------------------------------- #
def init_params(key):
    keys = jax.random.split(key, 6)
    p = {}
    p['w_time'] = jax.random.normal(keys[0], (1, MUL_TIME), jnp.float32)
    p['tp_ws'] = jax.random.normal(keys[1], (MUL_TIME, MUL_S_IN, C_S), jnp.float32)
    p['tp_wv'] = jax.random.normal(keys[2], (MUL_TIME, MUL_V_IN, C_V), jnp.float32)
    p['w_lin_s'] = jax.random.normal(keys[3], (NUM_LAYERS, C_S, C_S), jnp.float32)
    p['w_lin_v'] = jax.random.normal(keys[4], (NUM_LAYERS, C_V, C_V), jnp.float32)
    # e3nn BatchNorm affine defaults: weight = 1, bias = 0.
    p['bn_gamma_s'] = jnp.ones((NUM_LAYERS, 1, C_S), jnp.float32)
    p['bn_beta_s'] = jnp.zeros((NUM_LAYERS, 1, C_S), jnp.float32)
    p['bn_gamma_v'] = jnp.ones((NUM_LAYERS, 1, C_V), jnp.float32)
    p['w_ro'] = jax.random.normal(keys[5], (1, C_V), jnp.float32)
    return p


def fold_params(params):
    """Host-side algebraic folding into ONE bf16 weight slab.

    Called once per parameter set (hoisted out of the jitted per-call wrapper).
    Slab rows: [ 48: time-contracted TP | 48 per layer: o3.Linear (+ prev gamma)
                 | 3: transposed readout (+ last gamma) ], all with 48 lanes.
    """
    f32 = jnp.float32
    eye3 = jnp.eye(3, dtype=f32)

    # (1) Time path: 1x0e->16x0e o3.Linear pre-contracted into the TP weight
    # (exact, since t_emb = t * w_time for a single 0e input).
    wv_eff = TP_COEFF * jnp.einsum('i,ijk->jk', params['w_time'][0], params['tp_wv'])
    blocks = [jnp.kron(eye3, wv_eff)]                                            # [48,48]

    # (2) Per-layer o3.Linear(16x1o -> 16x1o): fold 1/sqrt(fan_in); fold the
    # PREVIOUS layer's BatchNorm affine gamma into this layer's weight rows.
    lin_scale = 1.0 / math.sqrt(MUL_V_IN)
    for layer in range(NUM_LAYERS):
        w = jnp.kron(eye3, params['w_lin_v'][layer]) * lin_scale                 # [48,48]
        if layer > 0:
            g_prev = jnp.tile(params['bn_gamma_v'][layer - 1, 0], (3,))          # [48]
            w = g_prev[:, None] * w
        blocks.append(w)

    # (3) Readout o3.Linear(32x0e + 16x1o -> 1x1o): only the 1o path exists.
    # Stored transposed ([3,48]) so the in-kernel last-BN fold is a row
    # broadcast; last layer's gamma folded in.
    g_last = jnp.tile(params['bn_gamma_v'][NUM_LAYERS - 1, 0], (3,))             # [48]
    w_ro_t = jnp.kron(eye3, params['w_ro']) * (1.0 / math.sqrt(MUL_V_IN))        # [3,48]
    w_ro_t = w_ro_t * g_last[None, :]
    blocks.append(w_ro_t)

    return jnp.concatenate(blocks, axis=0).astype(jnp.bfloat16)                  # [147,48]


# --------------------------------------------------------------------------- #
# Wrapper
# --------------------------------------------------------------------------- #
def _vmem_limit_bytes(n):
    # Packed bf16 input (double-buffered) + a few f32 [N,128]-padded temps +
    # weight slab + slack; capped at the v7x physical 64 MiB ceiling.
    n_pad = max(16, ((n + 15) // 16) * 16)
    per_row = 128 * (2 * 2 + 4 * 4)
    est = n_pad * per_row + 4 * VEC_DIM * 128 * 2 + (1 << 20)
    return int(min(64 * 1024 * 1024, max(4 * 1024 * 1024, est)))


def mace_equivariant_head_pallas(flat_node_features, flat_times, w_slab):
    n = flat_node_features.shape[0]

    # Lane-pack the live (1o) part of the e3nn layout
    # [16 scalars | 16x1o stored (channel, m)] into m-major [vx|vy|vz] lanes,
    # fuse the per-row diffusion-time scale into this copy (no padded [N,1]
    # operand, no in-kernel broadcast multiply), and cast to bf16 for the MXU.
    # The 0e branch is dead w.r.t. the 1o-only readout (see module-level note)
    # and its lanes are never shipped to the kernel.
    v = flat_node_features[:, MUL_S_IN:].reshape(n, MUL_V_IN, 3)
    v_slab = jnp.transpose(v, (0, 2, 1)).reshape(n, VEC_DIM)
    x = (flat_times * v_slab).astype(jnp.bfloat16)

    vmem = pltpu.MemorySpace.VMEM
    # Single grid cell: e3nn BatchNorm (train mode) needs FULL-batch statistics,
    # so the whole (small) problem lives in VMEM for one kernel invocation.
    # TODO(synk): for N beyond the VMEM budget, switch to a row-tiled two-pass
    # BatchNorm variant (accumulate per-channel sum-of-squares over an
    # 'arbitrary' row axis, then apply), splitting row tiles across v7x's two
    # TensorCores with a CMEM/core_barrier stats reduction.
    return pl.pallas_call(
        functools.partial(_head_kernel, num_layers=NUM_LAYERS),
        out_shape=jax.ShapeDtypeStruct((n, SPATIAL_DIM), jnp.float32),
        in_specs=[pl.BlockSpec(memory_space=vmem)] * 2,
        out_specs=pl.BlockSpec(memory_space=vmem),
        compiler_params=pltpu.CompilerParams(
            vmem_limit_bytes=_vmem_limit_bytes(n)),
    )(x, w_slab)


# --------------------------------------------------------------------------- #
# Plain-JAX f32 reference with the FULL module semantics (including the dead
# 0e branch), used to check that the kernel's algebraic folds are exact.
# --------------------------------------------------------------------------- #
def mace_equivariant_head_reference(flat_node_features, flat_times, params):
    n = flat_node_features.shape[0]
    s = flat_node_features[:, :MUL_S_IN]
    v = flat_node_features[:, MUL_S_IN:].reshape(n, MUL_V_IN, 3)
    t_emb = flat_times * params['w_time']
    xs = TP_COEFF * jnp.einsum('ni,nj,ijk->nk', t_emb, s, params['tp_ws'])
    xv = TP_COEFF * jnp.einsum('ni,njm,ijk->nkm', t_emb, v, params['tp_wv'])
    for layer in range(NUM_LAYERS):
        xs = xs @ params['w_lin_s'][layer] / math.sqrt(C_S)
        xv = jnp.einsum('njm,jk->nkm', xv, params['w_lin_v'][layer]) / math.sqrt(C_V)
        mean_s = xs.mean(axis=0, keepdims=True)
        xs_c = xs - mean_s
        var_s = (xs_c ** 2).mean(axis=0, keepdims=True)
        xs = (xs_c / jnp.sqrt(var_s + BN_EPS) * params['bn_gamma_s'][layer]
              + params['bn_beta_s'][layer])
        norm_v = (xv ** 2).mean(axis=-1).mean(axis=0)            # [C_V]
        xv = (xv / jnp.sqrt(norm_v + BN_EPS)[None, :, None]
              * params['bn_gamma_v'][layer][0][None, :, None])
        xs = SILU_CST * jax.nn.silu(xs)                          # dead w.r.t. output
    return jnp.einsum('njm,j->nm', xv, params['w_ro'][0]) / math.sqrt(C_V)


if __name__ == "__main__":
    key = jax.random.PRNGKey(0)
    k_feat, k_time, k_param = jax.random.split(key, 3)
    batch_size, num_atoms = 2, 8
    n = batch_size * num_atoms                        # flattened batch * atoms

    flat_node_features = jax.random.normal(k_feat, (n, FEAT_DIM), jnp.float32)
    flat_times = jax.random.uniform(k_time, (n, 1), jnp.float32)
    params = init_params(k_param)

    # Fold constants / time embedding / kron blocks ONCE, outside the jitted call.
    w_slab = fold_params(params)

    head = jax.jit(mace_equivariant_head_pallas)
    out = jax.block_until_ready(head(flat_node_features, flat_times, w_slab))
    assert out.shape == (n, SPATIAL_DIM)

    # Tolerance sized for the bf16 MXU matmuls (BN stats / inter-layer state are
    # f32); the f32 reference also computes the dead 0e branch, demonstrating
    # that dropping it leaves the forward output unchanged.
    ref = mace_equivariant_head_reference(flat_node_features, flat_times, params)
    np.testing.assert_allclose(np.asarray(out), np.asarray(ref), rtol=5e-2, atol=1e-1)

    print("KERNEL_OK")
</pallas_src>

<mosaic_0001>
module attributes {stable_mosaic.version = 11 : i64} {
  func.func @_head_kernel(%arg0: memref<16x48xbf16, #tpu.memory_space<vmem>>, %arg1: memref<147x48xbf16, #tpu.memory_space<vmem>>, %arg2: memref<16x3xf32, #tpu.memory_space<vmem>>) attributes {dimension_semantics = [], scalar_prefetch = 0 : i64, scratch_operands = 0 : i64, tpu.core_type = #tpu.core_type<tc>} {
    %c0 = arith.constant 0 : index
    %c0_0 = arith.constant 0 : index
    %0 = vector.load %arg0[%c0, %c0_0] : memref<16x48xbf16, #tpu.memory_space<vmem>>, vector<16x48xbf16>
    %c0_1 = arith.constant 0 : index
    %c0_2 = arith.constant 0 : index
    %1 = vector.load %arg1[%c0_1, %c0_2] : memref<147x48xbf16, #tpu.memory_space<vmem>>, vector<48x48xbf16>
    %cst = arith.constant dense<0.000000e+00> : vector<16x48xf32>
    %2 = tpu.matmul %0, %1, %cst {dimension_numbers = #tpu.dot_dimension_numbers<[1], [0], [0], [1], [0, 0, 1, 1], [], []>} : vector<16x48xbf16>, vector<48x48xbf16>, vector<16x48xf32> -> vector<16x48xf32>
    %3 = arith.truncf %2 : vector<16x48xf32> to vector<16x48xbf16>
    %c48 = arith.constant 48 : index
    %c0_3 = arith.constant 0 : index
    %4 = vector.load %arg1[%c48, %c0_3] : memref<147x48xbf16, #tpu.memory_space<vmem>>, vector<48x48xbf16>
    %cst_4 = arith.constant dense<0.000000e+00> : vector<16x48xf32>
    %5 = tpu.matmul %3, %4, %cst_4 {dimension_numbers = #tpu.dot_dimension_numbers<[1], [0], [0], [1], [0, 0, 1, 1], [], []>} : vector<16x48xbf16>, vector<48x48xbf16>, vector<16x48xf32> -> vector<16x48xf32>
    %6 = arith.mulf %5, %5 : vector<16x48xf32>
    %cst_5 = arith.constant dense<0.000000e+00> : vector<48xf32>
    %7 = vector.multi_reduction <add>, %6, %cst_5 [0] : vector<16x48xf32> to vector<48xf32>
    %8 = vector.shape_cast %7 : vector<48xf32> to vector<1x48xf32>
    %cst_6 = arith.constant 1.600000e+01 : f32
    %9 = vector.broadcast %cst_6 : f32 to vector<1x48xf32>
    %10 = arith.divf %8, %9 : vector<1x48xf32>
    %11 = vector.extract_strided_slice %10 {offsets = [0, 0], sizes = [1, 16], strides = [1, 1]} : vector<1x48xf32> to vector<1x16xf32>
    %12 = vector.extract_strided_slice %10 {offsets = [0, 16], sizes = [1, 16], strides = [1, 1]} : vector<1x48xf32> to vector<1x16xf32>
    %13 = arith.addf %11, %12 : vector<1x16xf32>
    %14 = vector.extract_strided_slice %10 {offsets = [0, 32], sizes = [1, 16], strides = [1, 1]} : vector<1x48xf32> to vector<1x16xf32>
    %15 = arith.addf %13, %14 : vector<1x16xf32>
    %cst_7 = arith.constant 0.333333343 : f32
    %16 = vector.broadcast %cst_7 : f32 to vector<1x16xf32>
    %17 = arith.mulf %15, %16 : vector<1x16xf32>
    %cst_8 = arith.constant 9.99999974E-6 : f32
    %18 = vector.broadcast %cst_8 : f32 to vector<1x16xf32>
    %19 = arith.addf %17, %18 : vector<1x16xf32>
    %20 = math.rsqrt %19 : vector<1x16xf32>
    %21 = tpu.concatenate %20, %20, %20 in 1 : vector<1x16xf32>, vector<1x16xf32>, vector<1x16xf32> -> vector<1x48xf32>
    %22 = vector.broadcast %21 : vector<1x48xf32> to vector<16x48xf32>
    %23 = arith.mulf %5, %22 : vector<16x48xf32>
    %24 = arith.truncf %23 : vector<16x48xf32> to vector<16x48xbf16>
    %c96 = arith.constant 96 : index
    %c0_9 = arith.constant 0 : index
    %25 = vector.load %arg1[%c96, %c0_9] : memref<147x48xbf16, #tpu.memory_space<vmem>>, vector<48x48xbf16>
    %cst_10 = arith.constant dense<0.000000e+00> : vector<16x48xf32>
    %26 = tpu.matmul %24, %25, %cst_10 {dimension_numbers = #tpu.dot_dimension_numbers<[1], [0], [0], [1], [0, 0, 1, 1], [], []>} : vector<16x48xbf16>, vector<48x48xbf16>, vector<16x48xf32> -> vector<16x48xf32>
    %27 = arith.mulf %26, %26 : vector<16x48xf32>
    %cst_11 = arith.constant dense<0.000000e+00> : vector<48xf32>
    %28 = vector.multi_reduction <add>, %27, %cst_11 [0] : vector<16x48xf32> to vector<48xf32>
    %29 = vector.shape_cast %28 : vector<48xf32> to vector<1x48xf32>
    %cst_12 = arith.constant 1.600000e+01 : f32
    %30 = vector.broadcast %cst_12 : f32 to vector<1x48xf32>
    %31 = arith.divf %29, %30 : vector<1x48xf32>
    %32 = vector.extract_strided_slice %31 {offsets = [0, 0], sizes = [1, 16], strides = [1, 1]} : vector<1x48xf32> to vector<1x16xf32>
    %33 = vector.extract_strided_slice %31 {offsets = [0, 16], sizes = [1, 16], strides = [1, 1]} : vector<1x48xf32> to vector<1x16xf32>
    %34 = arith.addf %32, %33 : vector<1x16xf32>
    %35 = vector.extract_strided_slice %31 {offsets = [0, 32], sizes = [1, 16], strides = [1, 1]} : vector<1x48xf32> to vector<1x16xf32>
    %36 = arith.addf %34, %35 : vector<1x16xf32>
    %cst_13 = arith.constant 0.333333343 : f32
    %37 = vector.broadcast %cst_13 : f32 to vector<1x16xf32>
    %38 = arith.mulf %36, %37 : vector<1x16xf32>
    %cst_14 = arith.constant 9.99999974E-6 : f32
    %39 = vector.broadcast %cst_14 : f32 to vector<1x16xf32>
    %40 = arith.addf %38, %39 : vector<1x16xf32>
    %41 = math.rsqrt %40 : vector<1x16xf32>
    %42 = tpu.concatenate %41, %41, %41 in 1 : vector<1x16xf32>, vector<1x16xf32>, vector<1x16xf32> -> vector<1x48xf32>
    %c144 = arith.constant 144 : index
    %c0_15 = arith.constant 0 : index
    %43 = vector.load %arg1[%c144, %c0_15] : memref<147x48xbf16, #tpu.memory_space<vmem>>, vector<3x48xbf16>
    %44 = arith.extf %43 : vector<3x48xbf16> to vector<3x48xf32>
    %45 = vector.broadcast %42 : vector<1x48xf32> to vector<3x48xf32>
    %46 = arith.mulf %44, %45 : vector<3x48xf32>
    %47 = arith.truncf %26 : vector<16x48xf32> to vector<16x48xbf16>
    %48 = arith.truncf %46 : vector<3x48xf32> to vector<3x48xbf16>
    %cst_16 = arith.constant dense<0.000000e+00> : vector<16x3xf32>
    %49 = tpu.matmul %47, %48, %cst_16 {dimension_numbers = #tpu.dot_dimension_numbers<[1], [1], [0], [0], [0, 0, 1, 0], [], []>} : vector<16x48xbf16>, vector<3x48xbf16>, vector<16x3xf32> -> vector<16x3xf32>
    %c0_17 = arith.constant 0 : index
    %c0_18 = arith.constant 0 : index
    %50 = vector.load %arg2[%c0_17, %c0_18] : memref<16x3xf32, #tpu.memory_space<vmem>>, vector<16x3xf32>
    tpu.vector_store %arg2[%c0_17, %c0_18], %49 {strides = array<i32>} : memref<16x3xf32, #tpu.memory_space<vmem>>, vector<16x3xf32>,
    return
  }
}

</mosaic_0001>

<bundles_post_ra>
// kernel: mace_equivariant_head_pallas.1
= control target key start
LH: loop header
LB: loop body
LE: loop exit
PB: predicated region body
PF: predicated region fallthrough
CT: control target
= control target key end

     0   :  { %v448_v0 = vmov 0.0   ;;  %vm449_vm0 = vmmov 0   ;;  %vm43_vm1 = vcmask 392192   ;;  %s451_s23 = smov 96   ;;  %s452_s30 = smov 16   ;;  %v193_v39 = vlaneseq  ;;  %s547_s1 = inlined_call_operand.vmem [shape: bf16[147,48], index: 1, kind: input, shape index: {}]   ;;  %s548_s0 = inlined_call_operand.vmem [shape: bf16[16,48], index: 0, kind: input, shape index: {}]   ;;  %s549_s2 = inlined_call_operand.vmem [shape: f32[16,3], index: 2, kind: output, shape index: {}]  }
   0x1   :  { %392 = vmatprep.subr.bf16.mxu0 %v448_v0  ;;  %v434_v1 = vld [vmem:[%s547_s1 + $0x10] sm:$0xff]   ;;  %398 = vmatprep.mubr.msk.bf16.mxu0 %vm449_vm0, %v448_v0  ;;  %v435_v2 = vld [vmem:[%s547_s1 + $0x8] sm:$0xff]   ;;  %v436_v3 = vld [vmem:[%s547_s1] sm:$0xff]   ;;  %s453_s3 = smov 32   ;;  %vm189_vm2 = vcmask 130048   ;;  %vm191_vm3 = vcmask 261120  }
   0x2   :  { %402 = vmatprep.subr.bf16.mxu1 %v448_v0  ;;  %408 = vmatprep.mubr.msk.bf16.mxu1 %vm449_vm0, %v448_v0  ;;  %v438_v4 = vld [vmem:[%s547_s1 + $0x28] sm:$0xff]   ;;  %v437_v5 = vld [vmem:[%s548_s0] sm:$0xff]   ;;  %v440_v7 = vld [vmem:[%s547_s1 + $0x18] sm:$0xff]   ;;  %s450_s0 = smov 112   ;;  %v194_v40 = vshrl.u32 %v193_v39, 7  ;;  %vm357_vm4 = vcmask 23552  }
   0x3   :  { %393 = vmatpush3.bf16.msra.mxu0 %v434_v1  ;;  %403 = vmatpush3.bf16.msra.mxu1 %v438_v4  ;;  %v439_v6 = vld [vmem:[%s547_s1 + $0x20] sm:$0xff]   ;;  %v442_v36 = vld [vmem:[%s547_s1 + $0x38] sm:$0xff]   ;;  %v443_v37 = vld [vmem:[%s547_s1 + $0x30] sm:$0xff]  }
   0x4   :  { %394 = vmatprep.subr.bf16.mxu0 %v448_v0  ;;  %404 = vmatprep.subr.bf16.mxu1 %v448_v0  ;;  %v441_v35 = vld [vmem:[%s547_s1 + $0x40] sm:$0xff]   ;;  %v195_v42 = vsub.s32 0, %v194_v40 }
   0x7   :  { %395 = vmatpush3.bf16.msra.mxu0 %v435_v2  ;;  %405 = vmatpush3.bf16.msra.mxu1 %v439_v6 }
   0x8   :  { %396 = vmatprep.subr.bf16.mxu0 %v448_v0  ;;  %406 = vmatprep.subr.bf16.mxu1 %v448_v0 }
   0xb   :  { %397 = vmatpush3.bf16.msra.mxu0 %v436_v3  ;;  %407 = vmatpush3.bf16.msra.mxu1 %v440_v7 }
   0xc   :  { %412 = vmatprep.subr.bf16.mxu0 %v448_v0  ;;  %422 = vmatprep.subr.bf16.mxu1 %v448_v0 }
   0xe   :  { %399 = vmatmul.mubr.msk.bf16.vlgmr.msra.gmra.mxu0 %vm43_vm1, %v437_v5 }
   0xf   :  { %418 = vmatprep.mubr.msk.bf16.mxu0 %vm449_vm0, %v448_v0  ;;  %413 = vmatpush3.bf16.msra.mxu0 %v441_v35 }
  0x10   :  { %414 = vmatprep.subr.bf16.mxu0 %v448_v0 }
  0x13   :  { %415 = vmatpush3.bf16.msra.mxu0 %v442_v36 }
  0x14   :  { %416 = vmatprep.subr.bf16.mxu0 %v448_v0 }
  0x17   :  { %417 = vmatpush3.bf16.msra.mxu0 %v443_v37 }
  0xce   :  { %v81_v8 = vpop.f32.mrf.mxu0 }
  0xd0   :  { %v400_v9 = vpop.f32.mrf.mxu0 }
  0xd2   :  { %v84_v10 = vpop.f32.mrf.mxu0 }
  0xd3   :  { %v88_v11 = vpack.c.bf16 %v84_v10, %v81_v8  ;;  %v301_v10 = vld [vmem:[%s547_s1 + $0x48] sm:$0x3] }
  0xd4   :  { %v401_v12 = vpop.f32.mrf.mxu0 }
  0xd5   :  { %409 = vmatmul.mubr.msk.bf16.vlgmr.msra.gmra.mxu1 %vm43_vm1, %v88_v11 }
  0xd6   :  { %424 = vmatprep.mubr.msk.bf16.mxu1 %vm449_vm0, %v448_v0 }
 0x195   :  { %v150_v13 = vpop.f32.mrf.mxu1 }
 0x196   :  { %v157_v15 = vmul.f32 %v150_v13, %v150_v13 }
 0x197   :  { %v410_v14 = vpop.f32.mrf.mxu1 }
 0x198   :  { %v159_v19 = vsel %vm43_vm1, %v157_v15, 0.0  ;;  %v302_v14 = vunpack.c.l.bf16 %v301_v10 }
 0x199   :  { %v153_v16 = vpop.f32.mrf.mxu1 }
 0x19a   :  { %v158_v17 = vmul.f32 %v153_v16, %v153_v16 }
 0x19b   :  { %v411_v18 = vpop.f32.mrf.mxu1 }
 0x19c   :  { %v160_v20 = vsel %vm43_vm1, %v158_v17, 0.0 }
 0x19d   :  { %v161_v21 = vadd.f32 %v160_v20, %v159_v19 }
 0x19f   :  { %v162_v22 = vrot.slane %v161_v21, 4 }
 0x1a1   :  { %v163_v23 = vadd.f32 %v162_v22, %v161_v21 }
 0x1a3   :  { %v164_v24 = vrot.slane %v163_v23, 2 }
 0x1a5   :  { %v165_v25 = vadd.f32 %v164_v24, %v163_v23 }
 0x1a7   :  { %v166_v26 = vrot.slane %v165_v25, 1 }
 0x1a9   :  { %v167_v27 = vadd.f32 %v166_v26, %v165_v25 }
 0x1ab   :  { %v169_v28 = vmul.f32 0.0625, %v167_v27 }
 0x1ad   :  { %171 = vrot.lane.b32.xlu0 %v169_v28, %s450_s0 }
 0x1b1   :  { %175 = vrot.lane.b32.xlu0 %v169_v28, %s451_s23 }
 0x21f   :  { %v172_v29 = vpop.permute.xlu0 %171 }
 0x220   :  { %v174_v30 = vadd.f32 %v172_v29, %v169_v28 }
 0x223   :  { %v176_v31 = vpop.permute.xlu0 %175 }
 0x224   :  { %v178_v32 = vadd.f32 %v176_v31, %v174_v30 }
 0x226   :  { %v179_v33 = vmul.f32 0.33333334, %v178_v32 }
 0x228   :  { %v180_v34 = vadd.f32 1e-05, %v179_v33 }
 0x22a   :  { %444 = vrsqrt.f32 %v180_v34 }
 0x237   :  { %v445_v38 = vpop.eup %444 }
 0x238   :  { %183 = vrot.lane.b32.xlu1 %v445_v38, %s452_s30 }
 0x23c   :  { %186 = vrot.lane.b32.xlu1 %v445_v38, %s453_s3 }
 0x2aa   :  { %v184_v41 = vpop.permute.xlu1 %183 }
 0x2ab   :  { %v190_v43 = vsel %vm189_vm2, %v445_v38, %v184_v41 }
 0x2ae   :  { %v187_v44 = vpop.permute.xlu1 %186 }
 0x2af   :  { %v192_v45 = vsel %vm191_vm3, %v190_v43, %v187_v44 }
 0x2b0   :  { %v196_v46 = vrot.slane %v192_v45, %v195_v42 }
 0x2b2   :  { %v197_v47 = vmul.f32 %v196_v46, %v150_v13  ;;  %v198_v48 = vmul.f32 %v196_v46, %v153_v16 }
 0x2b4   :  { %v199_v49 = vpack.c.bf16 %v198_v48, %v197_v47 }
 0x2b6   :  { %419 = vmatmul.mubr.msk.bf16.vlgmr.msra.gmra.mxu0 %vm43_vm1, %v199_v49 }
 0x376   :  { %v261_v50 = vpop.f32.mrf.mxu0 }
 0x377   :  { %v268_v52 = vmul.f32 %v261_v50, %v261_v50 }
 0x378   :  { %v420_v51 = vpop.f32.mrf.mxu0 }
 0x379   :  { %v270_v57 = vsel %vm43_vm1, %v268_v52, 0.0 }
 0x37a   :  { %v264_v53 = vpop.f32.mrf.mxu0 }
 0x37b   :  { %v269_v54 = vmul.f32 %v264_v53, %v264_v53  ;;  %v308_v55 = vpack.c.bf16 %v264_v53, %v261_v50 }
 0x37c   :  { %v421_v56 = vpop.f32.mrf.mxu0 }
 0x37d   :  { %v271_v58 = vsel %vm43_vm1, %v269_v54, 0.0 }
 0x37e   :  { %v272_v59 = vadd.f32 %v271_v58, %v270_v57 }
 0x380   :  { %v273_v60 = vrot.slane %v272_v59, 4 }
 0x382   :  { %v274_v61 = vadd.f32 %v273_v60, %v272_v59 }
 0x384   :  { %v275_v62 = vrot.slane %v274_v61, 2 }
 0x386   :  { %v276_v63 = vadd.f32 %v275_v62, %v274_v61 }
 0x388   :  { %v277_v0 = vrot.slane %v276_v63, 1 }
 0x38a   :  { %v278_v1 = vadd.f32 %v277_v0, %v276_v63 }
 0x38c   :  { %v279_v2 = vmul.f32 0.0625, %v278_v1 }
 0x38e   :  { %285 = vrot.lane.b32.xlu1 %v279_v2, %s451_s23  ;;  %281 = vrot.lane.b32.xlu0 %v279_v2, %s450_s0 }
 0x400   :  { %v282_v3 = vpop.permute.xlu0 %281  ;;  %v286_v5 = vpop.permute.xlu1 %285 }
 0x401   :  { %v284_v4 = vadd.f32 %v282_v3, %v279_v2 }
 0x403   :  { %v288_v6 = vadd.f32 %v286_v5, %v284_v4 }
 0x405   :  { %v289_v7 = vmul.f32 0.33333334, %v288_v6 }
 0x407   :  { %v290_v8 = vadd.f32 1e-05, %v289_v7 }
 0x409   :  { %446 = vrsqrt.f32 %v290_v8 }
 0x416   :  { %v447_v9 = vpop.eup %446 }
 0x417   :  { %296 = vrot.lane.b32.xlu1 %v447_v9, %s453_s3  ;;  %293 = vrot.lane.b32.xlu0 %v447_v9, %s452_s30 }
 0x489   :  { %v297_v11 = vpop.permute.xlu1 %296  ;;  %v294_v12 = vpop.permute.xlu0 %293 }
 0x48a   :  { %v299_v13 = vsel %vm189_vm2, %v447_v9, %v294_v12 }
 0x48b   :  { %v300_v15 = vsel %vm191_vm3, %v299_v13, %v297_v11 }
 0x48c   :  { %v306_v16 = vrot.slane %v300_v15, %v195_v42 }
 0x48e   :  { %v307_v17 = vmul.f32 %v306_v16, %v302_v14 }
 0x490   :  { %v309_v18 = vpack.c.bf16 %v307_v17, %v307_v17 }
 0x492   :  { %v314_v19 = vsel %vm43_vm1, %v309_v18, 0 }
 0x493   :  { %423 = vmatpush3.bf16.xpose.msra.mxu1 %v314_v19 }
 0x49a   :  { %425 = vmatmul.mubr.msk.bf16.vlgmr.msra.gmra.mxu1 %vm43_vm1, %v308_v55 }
 0x55a   :  { %v350_v20 = vpop.f32.mrf.mxu1 }
 0x55b   :  { %358 = vst.msk [vmem:[%s549_s2] sm:$0xff] %vm357_vm4, %v350_v20 }
 0x55c   :  { %v426_v21 = vpop.f32.mrf.mxu1 }
 0x55e   :  { %v353_v22 = vpop.f32.mrf.mxu1 }
 0x55f   :  { %359 = vst.msk [vmem:[%s549_s2 + $0x8] sm:$0xff] %vm357_vm4, %v353_v22 }
 0x560   :  { %v427_v23 = vpop.f32.mrf.mxu1 }

</bundles_post_ra>
